<compile_context>
chip_gen: v5e
topology: v5e:2x2
jax: 0.10.0
libtpu: 0.0.40
codegen_flags: <defaults>
</compile_context>

<pallas_src>
import functools

import jax
import jax.numpy as jnp
from jax.experimental import pallas as pl
from jax.experimental.pallas import tpu as pltpu


# ---------------------------------------------------------------------------
# Fused single-pass kernel: whole image (C, HW) in one block.
#   z = sigmoid(W_ex @ W_sq @ mean_hw(U));  q = sigmoid(w_s @ U)
#   out = U*z + U*q == U * (z + q)
# ---------------------------------------------------------------------------
def _scse_fused_kernel(x_ref, ws_ref, wsq_ref, wex_ref, o_ref, *, inv_hw):
    x = x_ref[...]                                                    # (C, HW)
    # cSE channel gate (tiny FCs, f32 accumulation).
    mean = jnp.sum(x, axis=-1, keepdims=True, dtype=jnp.float32) * inv_hw   # (C,1)
    s = jnp.dot(wsq_ref[...].astype(jnp.float32), mean,
                preferred_element_type=jnp.float32)                   # (C//2,1)
    e = jnp.dot(wex_ref[...].astype(jnp.float32), s,
                preferred_element_type=jnp.float32)                   # (C,1)
    z = jax.nn.sigmoid(e)                                             # (C,1) f32
    # sSE spatial gate.
    w = ws_ref[...].astype(x.dtype)                                   # (1,C)
    q = jax.nn.sigmoid(jnp.dot(w, x, preferred_element_type=jnp.float32))  # (1,HW)
    # Fused apply; only the small gate pieces are cast.
    gate = z.astype(x.dtype) + q.astype(x.dtype)                      # (C,HW)
    o_ref[...] = x * gate


# ---------------------------------------------------------------------------
# Two-pass path, pass 1: cSE channel gate z = sigmoid(W_ex @ (W_sq @ GAP(U)))
# ---------------------------------------------------------------------------
def _cse_gate_kernel(x_ref, wsq_ref, wex_ref, z_ref, *, inv_hw):
    # x_ref: (C, hw_tile); wsq_ref: (C//2, C); wex_ref: (C, C//2); z_ref: (C,1) f32
    h = pl.program_id(1)

    @pl.when(h == 0)
    def _init():
        z_ref[...] = jnp.zeros_like(z_ref)

    # f32-accumulated partial sum (padded columns are zero -> exact).
    z_ref[...] += jnp.sum(x_ref[...], axis=-1, keepdims=True, dtype=jnp.float32)

    @pl.when(h == pl.num_programs(1) - 1)
    def _finalize():
        mean = z_ref[...] * inv_hw                                    # (C, 1)
        s = jnp.dot(wsq_ref[...].astype(jnp.float32), mean,
                    preferred_element_type=jnp.float32)               # (C//2, 1)
        e = jnp.dot(wex_ref[...].astype(jnp.float32), s,
                    preferred_element_type=jnp.float32)               # (C, 1)
        z_ref[...] = jax.nn.sigmoid(e)


# ---------------------------------------------------------------------------
# Two-pass path, pass 2: out = U * (z + q),  q = sigmoid(w_s @ U)
# ---------------------------------------------------------------------------
def _scse_apply_kernel(x_ref, z_ref, ws_ref, o_ref):
    x = x_ref[...]                                                    # (C, hw_t)
    w = ws_ref[...].astype(x.dtype)                                   # (1, C)
    q = jax.nn.sigmoid(jnp.dot(w, x, preferred_element_type=jnp.float32))  # (1,hw_t)
    gate = z_ref[...].astype(x.dtype) + q.astype(x.dtype)             # (C, hw_t)
    o_ref[...] = x * gate


# ---------------------------------------------------------------------------
# Budgets / tiling helpers
# ---------------------------------------------------------------------------
def _vmem_capacity_bytes():
    try:
        info = pltpu.get_tpu_info()
        cap = getattr(info, "vmem_capacity_bytes", None)
        if cap:
            return int(cap)
    except Exception:
        pass
    return 64 * 1024 * 1024        # conservative default (v7x per-core VMEM)


def _budgets():
    """(two_pass_block_bytes, fused_block_bytes, vmem_limit_bytes) per TPU gen."""
    cap = _vmem_capacity_bytes()
    if cap >= 128 * 1024 * 1024:   # v5e / v6e: 128 MiB physical VMEM
        return 16 * 1024 * 1024, 10 * 1024 * 1024, 96 * 1024 * 1024
    # v7x: 64 MiB per TensorCore -> leave headroom for 2x(in+out) + temporaries.
    return 8 * 1024 * 1024, 6 * 1024 * 1024, 56 * 1024 * 1024


def _sublane_multiple(itemsize):
    # VMEM sublane padding of the second-minor dim: f32 -> 8, bf16 -> 16, int8 -> 32.
    return 8 * max(1, 4 // itemsize)


def _round_up(v, m):
    return -(-v // m) * m


# ---------------------------------------------------------------------------
# Wrapper
# ---------------------------------------------------------------------------
def scse_forward(x, w_s, w_sq, w_ex, *, force_two_pass=False, hw_tile=None):
    """scSE forward.  x: (B, C, H, W) NCHW.  Weights are the 1x1-conv kernels
    squeezed to 2D: w_s (1, C), w_sq (C//2, C), w_ex (C, C//2)."""
    B, C, H, W = x.shape
    HW = H * W
    x2 = x.reshape(B, C, HW)
    itemsize = x.dtype.itemsize

    two_pass_block, fused_block, vmem_cap = _budgets()
    c_pad = _round_up(C, _sublane_multiple(itemsize))      # sublane padding of C
    image_bytes = c_pad * _round_up(HW, 128) * itemsize    # padded (C, HW) block

    # ---------------- Fused single-pass path (small feature maps) -----------
    if image_bytes <= fused_block and not force_two_pass and hw_tile is None:
        out = pl.pallas_call(
            functools.partial(_scse_fused_kernel, inv_hw=1.0 / HW),
            out_shape=jax.ShapeDtypeStruct((B, C, HW), x.dtype),
            grid_spec=pltpu.PrefetchScalarGridSpec(
                num_scalar_prefetch=0,
                grid=(B,),
                in_specs=[
                    pl.BlockSpec((pl.Squeezed(), C, HW), lambda b: (b, 0, 0)),
                    pl.BlockSpec((1, C), lambda b: (0, 0)),
                    pl.BlockSpec((C // 2, C), lambda b: (0, 0)),
                    pl.BlockSpec((C, C // 2), lambda b: (0, 0)),
                ],
                out_specs=pl.BlockSpec((pl.Squeezed(), C, HW), lambda b: (b, 0, 0)),
            ),
            compiler_params=pltpu.CompilerParams(
                dimension_semantics=("parallel",),
                vmem_limit_bytes=vmem_cap),
        )(x2, w_s, w_sq, w_ex)
        return out.reshape(B, C, H, W)

    # ---------------- Two-pass path (large feature maps) --------------------
    # Pick a 128-aligned lane tile under the per-block budget; zero-pad HW up to
    # a multiple of the tile.  Padding is exact for the GAP (inv_hw uses the
    # true HW, padded columns are zero); padded output columns are sliced off.
    if hw_tile is not None:
        hw_t = int(hw_tile)
        hw_pad = _round_up(HW, hw_t)
    else:
        lanes = max(128, (two_pass_block // max(1, c_pad * itemsize)) // 128 * 128)
        lanes = min(lanes, 32768)
        if HW <= lanes:
            hw_t, hw_pad = HW, HW            # full-extent block: always legal
        else:
            hw_t = lanes
            hw_pad = _round_up(HW, hw_t)
    n_hw = hw_pad // hw_t
    x2p = x2 if hw_pad == HW else jnp.pad(x2, ((0, 0), (0, 0), (0, hw_pad - HW)))

    # ---- Pass 1: per-batch channel gate z (f32, shape (B, C, 1)) ----
    # TODO(synk): on v7x with B == 1, split n_hw into a leading 'parallel' factor
    # (per-core partial sums + tiny epilogue) so both TensorCores share the GAP.
    z = pl.pallas_call(
        functools.partial(_cse_gate_kernel, inv_hw=1.0 / HW),
        out_shape=jax.ShapeDtypeStruct((B, C, 1), jnp.float32),
        grid_spec=pltpu.PrefetchScalarGridSpec(
            num_scalar_prefetch=0,
            grid=(B, n_hw),
            in_specs=[
                pl.BlockSpec((pl.Squeezed(), C, hw_t), lambda b, h: (b, 0, h)),
                pl.BlockSpec((C // 2, C), lambda b, h: (0, 0)),
                pl.BlockSpec((C, C // 2), lambda b, h: (0, 0)),
            ],
            out_specs=pl.BlockSpec((pl.Squeezed(), C, 1), lambda b, h: (b, 0, 0)),
        ),
        compiler_params=pltpu.CompilerParams(
            dimension_semantics=("parallel", "arbitrary"),
            vmem_limit_bytes=vmem_cap),
    )(x2p, w_sq, w_ex)

    # ---- Pass 2: out = U * (z + sigmoid(w_s @ U)), tiled over (B, HW) ----
    out = pl.pallas_call(
        _scse_apply_kernel,
        out_shape=jax.ShapeDtypeStruct((B, C, hw_pad), x.dtype),
        grid_spec=pltpu.PrefetchScalarGridSpec(
            num_scalar_prefetch=0,
            grid=(B, n_hw),
            in_specs=[
                pl.BlockSpec((pl.Squeezed(), C, hw_t), lambda b, h: (b, 0, h)),
                pl.BlockSpec((pl.Squeezed(), C, 1), lambda b, h: (b, 0, 0)),
                pl.BlockSpec((1, C), lambda b, h: (0, 0)),
            ],
            out_specs=pl.BlockSpec((pl.Squeezed(), C, hw_t), lambda b, h: (b, 0, h)),
        ),
        compiler_params=pltpu.CompilerParams(
            dimension_semantics=("parallel", "parallel"),
            vmem_limit_bytes=vmem_cap),
    )(x2p, z, w_s)

    if hw_pad != HW:
        out = out[:, :, :HW]
    return out.reshape(B, C, H, W)


def scse_reference(x, w_s, w_sq, w_ex):
    """Pure-JAX reference mirroring the PyTorch forward (no ReLU, bias=False)."""
    xf = x.astype(jnp.float32)
    # sSE
    q = jax.nn.sigmoid(jnp.einsum('oc,bchw->bohw', w_s, xf))       # (B,1,H,W)
    u_sse = xf * q
    # cSE
    z = jnp.mean(xf, axis=(2, 3), keepdims=True)                   # (B,C,1,1)
    z = jnp.einsum('oc,bcij->boij', w_sq, z)                       # (B,C//2,1,1)
    z = jnp.einsum('oc,bcij->boij', w_ex, z)                       # (B,C,1,1)
    z = jax.nn.sigmoid(z)
    u_cse = xf * z
    return (u_cse + u_sse).astype(x.dtype)


if __name__ == "__main__":
    key = jax.random.PRNGKey(0)
    k_x, k_s, k_sq, k_ex, k_x2 = jax.random.split(key, 5)

    B, C, H, W = 2, 4, 16, 16
    x = jax.random.normal(k_x, (B, C, H, W), dtype=jnp.float32)

    # Deterministic 1x1-conv weights (kernel_size=1, bias=False), squeezed to 2D.
    w_s = jax.random.normal(k_s, (1, C), dtype=jnp.float32) * (1.0 / jnp.sqrt(C))
    w_sq = jax.random.normal(k_sq, (C // 2, C), dtype=jnp.float32) * (1.0 / jnp.sqrt(C))
    w_ex = jax.random.normal(k_ex, (C, C // 2), dtype=jnp.float32) * (1.0 / jnp.sqrt(C // 2))

    # 1) Fused single-pass path (small HW -> one block per image).
    out = jax.block_until_ready(scse_forward(x, w_s, w_sq, w_ex))
    ref = scse_reference(x, w_s, w_sq, w_ex)
    assert out.shape == (B, C, H, W)
    assert jnp.allclose(out, ref, atol=1e-5, rtol=1e-5), "fused path mismatch"

    # 2) Two-pass + HW-padding path (forced tiny tile, HW=400 not 128-aligned).
    H2 = W2 = 20
    x_b = jax.random.normal(k_x2, (B, C, H2, W2), dtype=jnp.float32)
    out_b = jax.block_until_ready(
        scse_forward(x_b, w_s, w_sq, w_ex, force_two_pass=True, hw_tile=128))
    ref_b = scse_reference(x_b, w_s, w_sq, w_ex)
    assert out_b.shape == (B, C, H2, W2)
    assert jnp.allclose(out_b, ref_b, atol=1e-5, rtol=1e-5), "two-pass path mismatch"

    print("KERNEL_OK")
</pallas_src>

<mosaic_0001>
module attributes {stable_mosaic.version = 11 : i64} {
  func.func @_scse_fused_kernel(%arg0: i32, %arg1: memref<1x4x256xf32, #tpu.memory_space<vmem>>, %arg2: memref<1x4xf32, #tpu.memory_space<vmem>>, %arg3: memref<2x4xf32, #tpu.memory_space<vmem>>, %arg4: memref<4x2xf32, #tpu.memory_space<vmem>>, %arg5: memref<1x4x256xf32, #tpu.memory_space<vmem>>) attributes {dimension_semantics = [#tpu.dimension_semantics<parallel>], iteration_bounds = array<i64: 2>, scalar_prefetch = 0 : i64, scratch_operands = 0 : i64, tpu.core_type = #tpu.core_type<tc>, window_params = [{transform_indices = @transform_0, window_bounds = array<i64: 1, 4, 256>}, {pipeline_mode = #tpu.pipeline_mode<synchronous>, transform_indices = @transform_1, window_bounds = array<i64: 1, 4>}, {pipeline_mode = #tpu.pipeline_mode<synchronous>, transform_indices = @transform_2, window_bounds = array<i64: 2, 4>}, {pipeline_mode = #tpu.pipeline_mode<synchronous>, transform_indices = @transform_3, window_bounds = array<i64: 4, 2>}, {transform_indices = @transform_4, window_bounds = array<i64: 1, 4, 256>}]} {
    %c0 = arith.constant 0 : index
    %c0_0 = arith.constant 0 : index
    %c0_1 = arith.constant 0 : index
    %0 = vector.load %arg1[%c0, %c0_0, %c0_1] : memref<1x4x256xf32, #tpu.memory_space<vmem>>, vector<1x4x256xf32>
    %1 = vector.shape_cast %0 : vector<1x4x256xf32> to vector<4x256xf32>
    %cst = arith.constant dense<0.000000e+00> : vector<4xf32>
    %2 = vector.multi_reduction <add>, %1, %cst [1] : vector<4x256xf32> to vector<4xf32>
    %3 = vector.shape_cast %2 : vector<4xf32> to vector<4x1xf32>
    %cst_2 = arith.constant 3.906250e-03 : f32
    %4 = vector.broadcast %cst_2 : f32 to vector<4x1xf32>
    %5 = arith.mulf %3, %4 : vector<4x1xf32>
    %c0_3 = arith.constant 0 : index
    %c0_4 = arith.constant 0 : index
    %6 = vector.load %arg3[%c0_3, %c0_4] : memref<2x4xf32, #tpu.memory_space<vmem>>, vector<2x4xf32>
    %cst_5 = arith.constant dense<0.000000e+00> : vector<2x1xf32>
    %7 = tpu.matmul %6, %5, %cst_5 {dimension_numbers = #tpu.dot_dimension_numbers<[1], [0], [0], [1], [0, 0, 1, 1], [], []>} : vector<2x4xf32>, vector<4x1xf32>, vector<2x1xf32> -> vector<2x1xf32>
    %c0_6 = arith.constant 0 : index
    %c0_7 = arith.constant 0 : index
    %8 = vector.load %arg4[%c0_6, %c0_7] : memref<4x2xf32, #tpu.memory_space<vmem>>, vector<4x2xf32>
    %cst_8 = arith.constant dense<0.000000e+00> : vector<4x1xf32>
    %9 = tpu.matmul %8, %7, %cst_8 {dimension_numbers = #tpu.dot_dimension_numbers<[1], [0], [0], [1], [0, 0, 1, 1], [], []>} : vector<4x2xf32>, vector<2x1xf32>, vector<4x1xf32> -> vector<4x1xf32>
    %10 = arith.negf %9 : vector<4x1xf32>
    %11 = math.exp %10 : vector<4x1xf32>
    %cst_9 = arith.constant 1.000000e+00 : f32
    %12 = vector.broadcast %cst_9 : f32 to vector<4x1xf32>
    %13 = arith.addf %12, %11 : vector<4x1xf32>
    %14 = arith.divf %12, %13 : vector<4x1xf32>
    %c0_10 = arith.constant 0 : index
    %c0_11 = arith.constant 0 : index
    %15 = vector.load %arg2[%c0_10, %c0_11] : memref<1x4xf32, #tpu.memory_space<vmem>>, vector<1x4xf32>
    %cst_12 = arith.constant dense<0.000000e+00> : vector<1x256xf32>
    %16 = tpu.matmul %15, %1, %cst_12 {dimension_numbers = #tpu.dot_dimension_numbers<[1], [0], [0], [1], [0, 0, 1, 1], [], []>} : vector<1x4xf32>, vector<4x256xf32>, vector<1x256xf32> -> vector<1x256xf32>
    %17 = arith.negf %16 : vector<1x256xf32>
    %18 = math.exp %17 : vector<1x256xf32>
    %cst_13 = arith.constant 1.000000e+00 : f32
    %19 = vector.broadcast %cst_13 : f32 to vector<1x256xf32>
    %20 = arith.addf %19, %18 : vector<1x256xf32>
    %21 = arith.divf %19, %20 : vector<1x256xf32>
    %22 = vector.broadcast %14 : vector<4x1xf32> to vector<4x256xf32>
    %23 = vector.broadcast %21 : vector<1x256xf32> to vector<4x256xf32>
    %24 = arith.addf %22, %23 : vector<4x256xf32>
    %25 = arith.mulf %1, %24 : vector<4x256xf32>
    %c0_14 = arith.constant 0 : index
    %c0_15 = arith.constant 0 : index
    %c0_16 = arith.constant 0 : index
    %26 = vector.load %arg5[%c0_14, %c0_15, %c0_16] : memref<1x4x256xf32, #tpu.memory_space<vmem>>, vector<1x4x256xf32>
    %27 = vector.shape_cast %26 : vector<1x4x256xf32> to vector<4x256xf32>
    %28 = vector.shape_cast %25 : vector<4x256xf32> to vector<1x4x256xf32>
    tpu.vector_store %arg5[%c0_14, %c0_15, %c0_16], %28 {strides = array<i32>} : memref<1x4x256xf32, #tpu.memory_space<vmem>>, vector<1x4x256xf32>,
    return
  }
  func.func @transform_0(%arg0: i32) -> (i32, i32, i32) {
    %c0_i32 = arith.constant 0 : i32
    %c0_i32_0 = arith.constant 0 : i32
    %c0_i32_1 = arith.constant 0 : i32
    return %arg0, %c0_i32, %c0_i32_0 : i32, i32, i32
  }
  func.func @transform_1(%arg0: i32) -> (i32, i32) {
    %c0_i32 = arith.constant 0 : i32
    %c0_i32_0 = arith.constant 0 : i32
    %c0_i32_1 = arith.constant 0 : i32
    return %c0_i32, %c0_i32_0 : i32, i32
  }
  func.func @transform_2(%arg0: i32) -> (i32, i32) {
    %c0_i32 = arith.constant 0 : i32
    %c0_i32_0 = arith.constant 0 : i32
    %c0_i32_1 = arith.constant 0 : i32
    return %c0_i32, %c0_i32_0 : i32, i32
  }
  func.func @transform_3(%arg0: i32) -> (i32, i32) {
    %c0_i32 = arith.constant 0 : i32
    %c0_i32_0 = arith.constant 0 : i32
    %c0_i32_1 = arith.constant 0 : i32
    return %c0_i32, %c0_i32_0 : i32, i32
  }
  func.func @transform_4(%arg0: i32) -> (i32, i32, i32) {
    %c0_i32 = arith.constant 0 : i32
    %c0_i32_0 = arith.constant 0 : i32
    %c0_i32_1 = arith.constant 0 : i32
    return %arg0, %c0_i32, %c0_i32_0 : i32, i32, i32
  }
}

</mosaic_0001>

<bundles_post_ra>
// kernel: tpu_custom_call.1
= control target key start
LH: loop header
LB: loop body
LE: loop exit
PB: predicated region body
PF: predicated region fallthrough
CT: control target
= control target key end

     0   :  { %9 = vsyncpa [#allocation3], 0  ;;  %s860_s0 = inlined_call_operand.hbm [shape: f32[2,4,256], index: 0, kind: input, shape index: {}]   ;;  %s861_s1 = inlined_call_operand.vmem [shape: f32[1,4], index: 1, kind: input, shape index: {}]   ;;  %s862_s2 = inlined_call_operand.vmem [shape: f32[2,4], index: 2, kind: input, shape index: {}]   ;;  %s863_s3 = inlined_call_operand.vmem [shape: f32[4,2], index: 3, kind: input, shape index: {}]   ;;  %s864_s4 = inlined_call_operand.hbm [shape: f32[2,4,256], index: 4, kind: output, shape index: {}]  }
   0x1   :  { %11 = vsyncpa [#allocation3 + $0x1], 0 }
   0x2   :  { %12 = vsyncpa [#allocation4], 0 }
   0x3   :  { %14 = vsyncpa [#allocation4 + $0x1], 0  ;;  %s709_s15 = smov 0   ;;  %s711_s16 = smov 0  }
   0x4   :  { %s713_s17 = smov 0   ;;  %s715_s18 = smov 0  }
   0x5 LB: > { %s730_s19 = sadd.s32 4294967295, %s681_s18   ;;  %s498_s20 = sadd.s32 4294967294, %s681_s18   ;;  %s681_s18 = sphi %s715_s18, %s874_s18   ;;  %s677_s17 = sphi %s713_s17, %s873_s17   ;;  %s673_s16 = sphi %s711_s16, %s872_s16   ;;  %s669_s15 = sphi %s709_s15, %s871_s15  }
   0x6   : > { %s734_s21 = sadd.s32 1, %s681_s18   ;;  %s27_s22 = sadd.s32 1, %s677_s17 }
   0x7   : > { %s24_s23 = ssub.s32 %s681_s18, %s734_s21  ;;  %p34_p0 = scmp.ne.s32.totalorder %s677_s17, %s673_s16 }
   0x8   : > { %p25_p1 = scmp.eq.s32.totalorder %s24_s23, 0  ;;  %p35_p2 = scmp.eq.s32.totalorder %s681_s18, 0 }
   0x9   : > { %p40_p3 = scmp.ne.s32.totalorder %s673_s16, %s669_s15  ;;  %p41_p4 = scmp.eq.s32.totalorder %s730_s19, 0 }
   0xa   : > { %s746_s24 = scalar_select %p25_p1, %s677_s17, %s27_s22  }
   0xb   : > { %p748_p5 = por %p35_p2, %p34_p0  ;;  %p752_p6 = por %p41_p4, %p40_p3 }
   0xc   : > { %p127_p7 = scmp.eq.s32.totalorder %s730_s19, 1  ;;  %p133_p8 = scmp.eq.s32.totalorder %s498_s20, 1 }
   0xd   : > { %p537_p10 = scmp.lt.s32.totalorder %s681_s18, 2  ;;  %s162_s29 = sand.u32 1, %s677_s17  }
   0xe   : > { %p759_p11 = por %p127_p7, %p34_p0  ;;  %p763_p12 = por %p133_p8, %p40_p3 }
   0xf   : > { %s523_s30 = sshll.u32 %s681_s18, 3  ;;  %s501_s5 = sshll.u32 %s162_s29, 3 }
  0x10   : > { %s171_s8 = scalar_lea.hbm %s860_s0, %s523_s30  ;;  %s166_s10 = scalar_lea.vmem [#allocation2], %s501_s5 }
  0x11   : > { %s173_s9 = sshll.u32 %s171_s8, 4  ;;  %s175_s11 = sshll.u32 %s166_s10, 4  ;;  %s174_s9 = int_to_ptr.hbm [resolvable:$true] %s173_s9  ;;  %s176_s11 = int_to_ptr.vmem [resolvable:$true] %s175_s11 }
  0x12   : > { %p774_p13 = pnand %p537_p10, %p748_p5  ;;  %p504_p0 = scmp.ge.s32.totalorder %s681_s18, 1 }
  0x13   : > { %p180_p1 = scmp.lt.s32.totalorder %s681_s18, 3  ;;  %s163_s13 = scalar_lea.sflag [#allocation3], %s162_s29 }
  0x14   : > { %s585_s14 = sshra.s32 %s174_s9, 4  ;;  %p589_p3 = pneg %p774_p13  ;;  %s586_s14 = int_to_ptr.hbm [resolvable:$true] %s585_s14 }
  0x15   : > { %s587_s20 = scalar_lea.hbm %s586_s14, 8  ;;  %s592_s25 = scalar_lea.hbm %s860_s0, 16 }
  0x16   : > { %p588_p2 = scmp.ne.s32.totalorder %s586_s14, %s587_s20  ;;  %p593_p5 = scmp.lt.s32.totalorder %s586_s14, %s860_s0 }
  0x17   : > { %p594_p8 = scmp.lt.s32.totalorder %s592_s25, %s587_s20 }
  0x18   : > { %p590_p4 = pnand %p589_p3, %p588_p2 }
  0x19   : > { %p595_p10 = por %p594_p8, %p593_p5 }
  0x1a   : > { %p591_p7 = pneg %p590_p4 }
  0x1c   : > { %p596_p9 = pnand %p595_p10, %p591_p7 }
  0x1e   : > { %599 = shalt.err (!%p596_p9)
}
  0x1f   : > { %532 = dma.hbm_to_vmem [thread:$0]  (!%p774_p13), %s174_s9, 128, %s176_s11, %s163_s13  }
  0x20   : > { %p181_p2 = pnand %p504_p0, %p180_p1 }
  0x21   : > { %s795_s29 = sand.u32 (!%p181_p2), 1, %s673_s16  }
  0x22   : > { %184 = sbr.rel (%p181_p2) target bundleno = 577 (0x241), region = 36  ;;  %s505_s6 = sshll.u32 (!%p181_p2), %s795_s29, 3 }
  0x23   : > { %s187_s7 = scalar_lea.sflag (!%p181_p2), [#allocation3], %s795_s29  ;;  %s190_s8 = scalar_lea.vmem (!%p181_p2), [#allocation2], %s505_s6 }
  0x27   : > { %660 = dma.done.wait (%p752_p6), %s187_s7, 128  }
  0x28   : > { %662 = vsyncadd (%p752_p6), %s187_s7, 4294967168  ;;  %v805_v0 = vld [vmem:[%s190_s8] sm:$0xff]  ;;  %vm223_vm0 = vcmask 1043456   ;;  %v230_v8 = vld [vmem:[%s862_s2] sm:$0x3]  ;;  %vm231_vm1 = vcmask 31744  }
  0x29   : > { %218 = vst [vmem:[#allocation1] ss:$2 sm:$0xff] %v805_v0  ;;  %v306_v10 = vld [vmem:[%s861_s1] sm:$0x1]  ;;  %vm263_vm2 = vcmask 1041408   ;;  %vm259_vm3 = vcmask 15360  }
  0x2a   : > { %v258_v12 = vld [vmem:[%s863_s3] sm:$0xf]  ;;  %v683_v14 = vmov 0   ;;  %s524_s14 = sshll.u32 %s730_s19, 3  ;;  %s215_s25 = scalar_lea.vmem [#allocation5], %s505_s6 }
  0x2b   : > { %572 = vset.pattern.permute.xlu0 %v683_v14  ;;  %s423_s23 = scalar_lea.hbm %s864_s4, %s524_s14  ;;  %s425_s30 = sshll.u32 %s215_s25, 4  ;;  %s426_s30 = int_to_ptr.vmem [resolvable:$true] %s425_s30 }
  0x2c   : > { %s427_s5 = sshll.u32 %s423_s23, 4  ;;  %s412_s19 = scalar_lea.sflag [#allocation4], %s795_s29  ;;  %s428_s5 = int_to_ptr.hbm [resolvable:$true] %s427_s5 }
  0x2d   : > { %s629_s7 = sshra.s32 %s428_s5, 4  ;;  %s635_s6 = scalar_lea.hbm %s864_s4, 16  ;;  %s630_s7 = int_to_ptr.hbm [resolvable:$true] %s629_s7 }
  0x2e   : > { %s631_s8 = scalar_lea.hbm %s630_s7, 8  ;;  %p636_p0 = scmp.lt.s32.totalorder %s630_s7, %s864_s4 }
  0x2f   : > { %p632_p6 = scmp.ne.s32.totalorder %s630_s7, %s631_s8  ;;  %p637_p1 = scmp.lt.s32.totalorder %s635_s6, %s631_s8 }
  0x30   : > { %v219_v1 = vld.sshfl [vmem:[#allocation1] sm:$0xff pattern:$0x75316420]  ;;  %v220_v2 = vld.sshfl [vmem:[#allocation1 + $0x8] sm:$0xff pattern:$0x75316420] }
  0x31   : > { %v224_v3 = vsel %vm223_vm0, %v219_v1, 0.0  ;;  %v225_v4 = vsel %vm223_vm0, %v220_v2, 0.0  ;;  %307 = vst [vmem:[#allocation1] ss:$2 sm:$0xff] %v805_v0  ;;  %p633_p9 = pnand %p632_p6, %p759_p11  ;;  %p638_p3 = por %p637_p1, %p636_p0 }
  0x32   : > { %v226_v5 = vadd.f32 %v225_v4, %v224_v3 }
  0x33   : > { %p634_p13 = pneg %p633_p9 }
  0x34   : > { %227 = vadd.xlane.f32.xlu0 %v226_v5 }
  0x35   : > { %p639_p4 = pnand %p638_p3, %p634_p13 }
  0x38   : > { %v309_v9 = vld.sshfl [vmem:[#allocation1 + $0x8] sm:$0xff pattern:$0x75316420]  ;;  %v308_v11 = vld.sshfl [vmem:[#allocation1] sm:$0xff pattern:$0x75316420] }
  0x39   : > { %514 = vmatpush.msk.msra.mxu3 %vm223_vm0, %v309_v9  ;;  %512 = vmatpush.msk.msra.mxu2 %vm223_vm0, %v308_v11 }
  0x3a   : > { %515 = vmatmul.msk.f32.vlgmr.msra.gmra.mxu3 %vm231_vm1, %v306_v10  ;;  %513 = vmatmul.msk.f32.vlgmr.msra.gmra.mxu2 %vm231_vm1, %v306_v10 }
  0xa7   : > { %v228_v6 = vpop.xlane.xlu0 %227 }
  0xa8   : > { %v229_v7 = vmul.f32 0.00390625, %v228_v6 }
  0xaa   : > { %507 = vmatpush.msk.msra.mxu0 %vm223_vm0, %v229_v7 }
  0xab   : > { %508 = vmatmul.msk.f32.vlgmr.msra.gmra.mxu0 %vm231_vm1, %v230_v8 }
  0xbd   : > { %v354_v29 = vpop.f32.mrf.mxu3  ;;  %v334_v30 = vpop.f32.mrf.mxu2 }
  0xbe   : > { %v517_v31 = vmul.f32 -1.442695, %v354_v29  ;;  %v516_v32 = vmul.f32 -1.442695, %v334_v30 }
 0x128   : > { %v255_v13 = vpop.f32.mrf.mxu0 }
 0x129   : > { %509 = vmatpush.msk.msra.mxu1 %vm263_vm2, %v255_v13 }
 0x12a   : > { %510 = vmatmul.msk.f32.vlgmr.msra.gmra.mxu1 %vm259_vm3, %v258_v12 }
 0x1a7   : > { %v284_v15 = vpop.f32.mrf.mxu1 }
 0x1a8   : > { %v511_v16 = vmul.f32 -1.442695, %v284_v15 }
 0x1aa   : > { %573 = vpow2.f32 %v511_v16 }
 0x1b0   : > { %v574_v17 = vpop.eup %573 }
 0x1b1   : > { %v290_v18 = vadd.f32 1.0, %v574_v17 }
 0x1b3   : > { %575 = vrcp.f32 %v290_v18  ;;  %v302_v22 = vand.u32 2147483648, %v290_v18  ;;  %v300_v24 = vand.u32 2147483647, %v290_v18  ;;  %vm296_vm5 = vweird.f32 %v290_v18 }
 0x1b4   : > { %577 = vpow2.f32 %v517_v31 }
 0x1b5   : > { %v303_v26 = vor.u32 1.1754944e-38, %v302_v22  ;;  %vm301_vm7 = vcmp.eq.f32.partialorder %v300_v24, 8.507059e+37  ;;  %579 = vpow2.f32 %v516_v32 }
 0x1b9   : > { %v576_v19 = vpop.eup %575 }
 0x1ba   : > { %v292_v20 = vmul.f32 %v576_v19, %v290_v18  ;;  %vm297_vm4 = vweird.f32 %v576_v19  ;;  %v578_v33 = vpop.eup %577 }
 0x1bb   : > { %vm298_vm6 = vmor %vm296_vm5, %vm297_vm4  ;;  %v580_v34 = vpop.eup %579  ;;  %v364_v35 = vadd.f32 1.0, %v578_v33 }
 0x1bc   : > { %v293_v21 = vsub.f32 1.0, %v292_v20  ;;  %v363_v36 = vadd.f32 1.0, %v580_v34 }
 0x1bd   : > { %581 = vrcp.f32 %v364_v35  ;;  %vm385_vm8 = vweird.f32 %v364_v35  ;;  %v391_v45 = vand.u32 2147483648, %v364_v35  ;;  %v389_v47 = vand.u32 2147483647, %v364_v35 }
 0x1be   : > { %v294_v23 = vmul.f32 %v576_v19, %v293_v21  ;;  %583 = vrcp.f32 %v363_v36  ;;  %vm370_vm10 = vweird.f32 %v363_v36  ;;  %v376_v48 = vand.u32 2147483648, %v363_v36 }
 0x1bf   : > { %v374_v50 = vand.u32 2147483647, %v363_v36  ;;  %v392_v51 = vor.u32 1.1754944e-38, %v391_v45  ;;  %vm390_vm14 = vcmp.eq.f32.partialorder %v389_v47, 8.507059e+37 }
 0x1c0   : > { %v295_v25 = vadd.f32 %v576_v19, %v294_v23  ;;  %v377_v53 = vor.u32 1.1754944e-38, %v376_v48 }
 0x1c1   : > { %vm375_vm15 = vcmp.eq.f32.partialorder %v374_v50, 8.507059e+37 }
 0x1c2   : > { %v299_v27 = vsel %vm298_vm6, %v576_v19, %v295_v25 }
 0x1c3   : > { %v304_v28 = vsel %vm301_vm7, %v303_v26, %v299_v27  ;;  %v582_v37 = vpop.eup %581 }
 0x1c4   : > { %397 = vperm.xlu0 %572, %v304_v28   ;;  %v584_v38 = vpop.eup %583  ;;  %v381_v39 = vmul.f32 %v582_v37, %v364_v35  ;;  %vm386_vm9 = vweird.f32 %v582_v37 }
 0x1c5   : > { %v366_v40 = vmul.f32 %v584_v38, %v363_v36  ;;  %vm371_vm11 = vweird.f32 %v584_v38  ;;  %vm387_vm12 = vmor %vm385_vm8, %vm386_vm9 }
 0x1c6   : > { %v382_v41 = vsub.f32 1.0, %v381_v39  ;;  %vm372_vm13 = vmor %vm370_vm10, %vm371_vm11 }
 0x1c7   : > { %v367_v42 = vsub.f32 1.0, %v366_v40 }
 0x1c8   : > { %v383_v43 = vmul.f32 %v582_v37, %v382_v41 }
 0x1c9   : > { %v368_v44 = vmul.f32 %v584_v38, %v367_v42 }
 0x1ca   : > { %v384_v46 = vadd.f32 %v582_v37, %v383_v43 }
 0x1cb   : > { %v369_v49 = vadd.f32 %v584_v38, %v368_v44 }
 0x1cc   : > { %v388_v52 = vsel %vm387_vm12, %v582_v37, %v384_v46 }
 0x1cd   : > { %v373_v54 = vsel %vm372_vm13, %v584_v38, %v369_v49  ;;  %v393_v55 = vsel %vm390_vm14, %v392_v51, %v388_v52 }
 0x1ce   : > { %v378_v56 = vsel %vm375_vm15, %v377_v53, %v373_v54  ;;  %v401_v57 = vperm.slane %v393_v55, 0 }
 0x1cf   : > { %v400_v59 = vperm.slane %v378_v56, 0 }
 0x236   : > { %v398_v58 = vpop.permute.xlu0 %397 }
 0x237   : > { %v403_v60 = vadd.f32 %v401_v57, %v398_v58  ;;  %v402_v61 = vadd.f32 %v400_v59, %v398_v58 }
 0x239   : > { %v406_v62 = vrot.slane %v403_v60, 4 }
 0x23b   : > { %v407_v63 = vsel %vm223_vm0, %v402_v61, %v406_v62 }
 0x23c   : > { %v409_v1 = vmul.f32 %v407_v63, %v805_v0 }
 0x23e   : > { %410 = vst [vmem:[%s215_s25] sm:$0xff] %v409_v1 }
 0x23f   : > { %642 = shalt.err (!%p639_p4)
}
 0x240   : > { %527 = dma.vmem_to_hbm [thread:$0]  (%p759_p11), %s426_s30, 128, %s428_s5, %s412_s19  }
 0x241 PF: > { %s439_s29 = sand.u32 1, %s669_s15   ;;  %p870_p7 = scmp.ge.s32.totalorder %s681_s18, 2 }
 0x242   : > { %s440_s12 = scalar_lea.sflag [#allocation4], %s439_s29 }
 0x243   : > { %p534_p5 = pnand %p870_p7, %p763_p12 }
 0x245   : > { %p535_p8 = pneg %p534_p5 }
 0x247   : > { %664 = dma.done.wait (%p535_p8), %s440_s12, 128  }
 0x248   : > { %666 = vsyncadd (%p535_p8), %s440_s12, 4294967168  ;;  %p17_p10 = scmp.ge.s32.totalorder %s734_s21, 4   ;;  %s871_s15 = smov %s673_s16 }
 0x249   : > { %s872_s16 = smov %s677_s17  ;;  %s873_s17 = smov %s746_s24 }
 0x24a   : > { %s874_s18 = smov %s734_s21  ;;  %19 = sbr.rel (!%p17_p10) target bundleno = 5 (0x5), region = 81 }
 0x24f   :  { %446 = vsyncpa [#allocation3], 1 }
 0x250   :  { %448 = vsyncpa [#allocation3 + $0x1], 1 }
 0x251   :  { %449 = vsyncpa [#allocation4], 1 }
 0x252   :  { %451 = vsyncpa [#allocation4 + $0x1], 1 }

</bundles_post_ra>
